<compile_context>
chip_gen: v7x
topology: tpu7x:2x2x1
jax: 0.10.0
libtpu: 0.0.40
codegen_flags: <defaults>
</compile_context>

<pallas_src>
import functools
import math

import jax
import jax.numpy as jnp
from jax.experimental import pallas as pl
from jax.experimental.pallas import tpu as pltpu


def _round_up(x, m):
    return ((x + m - 1) // m) * m


def _rep_tracker_kernel(hist_ref, mask_ref, w1_ref, b1_ref, g_ref, bta_ref,
                        w2_ref, b2_ref, out_ref, *, T, F, cutoff, inv_emb,
                        approx_gelu):
    # hist block is (TB, T*F): time x freq flattened onto the lane axis so 8
    # batch rows pack per f32 vreg and each HBM row is one contiguous DMA run.
    x = hist_ref[...].astype(jnp.float32)             # upcast (bf16 inputs allowed)
    m = mask_ref[...]                                  # (1, T*F) float {0,1}: f < cutoff
    n = T * cutoff                                     # valid elements per batch row

    # torch.nan_to_num(nan=0, posinf=1, neginf=-1) fused with the cutoff mask
    # (saves one full-tile select and the per-step iota).
    ok = jnp.logical_and(jnp.logical_not(jnp.isnan(x)), m > 0.0)
    x_if = jnp.where(x == jnp.inf, 1.0, jnp.where(x == -jnp.inf, -1.0, x))
    xm = jnp.where(ok, x_if, 0.0)                      # (TB, T*F) finite, masked

    # Per-frequency sums over time via static lane slices of width F.
    col_sum = xm[:, 0:F]
    for t in range(1, T):
        col_sum = col_sum + xm[:, t * F:(t + 1) * F]
    x_last = xm[:, (T - 1) * F:T * F]                  # latest time step, (TB, F)

    # Stats over (time, freq).  sum_x derived from col_sum (no extra full-tile
    # reduction); unbiased variance is two-pass like torch.std (no cancellation).
    sum_x = jnp.sum(col_sum, axis=-1, keepdims=True)   # (TB, 1)
    mean = sum_x * (1.0 / n)
    dev = (xm - mean) * m                              # masked lanes contribute 0
    var = jnp.sum(dev * dev, axis=-1, keepdims=True) * (1.0 / (n - 1))
    std = jnp.sqrt(var) + 1e-6
    inv_std = pl.reciprocal(std, approx=True)          # EUP slot; ~1e-4 rel err vs exact

    past_raw = (col_sum - x_last) * (1.0 / (T - 1))    # mean of the first T-1 steps
    latest = (x_last - mean) * inv_std                 # (TB, F)
    past = (past_raw - mean) * inv_std
    # No extra cutoff select here: on masked lanes latest == past (diff == 0
    # exactly) and the detector's w1 rows for f >= cutoff are zero-padded.

    # Simplified DTW for length-1 sequences: plain L2 distance -> exp similarity.
    diff = latest - past
    dist = jnp.sqrt(jnp.sum(diff * diff, axis=-1, keepdims=True))   # (TB, 1)
    dtw_sim = jnp.exp(dist * (-inv_emb))                            # (TB, 1)

    # Pattern detector: Linear -> LayerNorm -> GELU -> Linear(1) -> Sigmoid.
    h = jnp.dot(latest, w1_ref[...], preferred_element_type=jnp.float32) + b1_ref[...]
    mu = jnp.mean(h, axis=-1, keepdims=True)
    hc = h - mu
    v = jnp.mean(hc * hc, axis=-1, keepdims=True)
    hn = hc * jax.lax.rsqrt(v + 1e-5) * g_ref[...] + bta_ref[...]
    if approx_gelu:
        # tanh GELU runs on the EUP slot (exact erf is a long VALU polynomial).
        c = math.sqrt(2.0 / math.pi)
        hg = 0.5 * hn * (1.0 + jnp.tanh(c * (hn + 0.044715 * hn * hn * hn)))
    else:
        hg = 0.5 * hn * (1.0 + jax.lax.erf(hn * (1.0 / math.sqrt(2.0))))
    # Second Linear has out_features=1: VPU broadcast-multiply + lane reduction.
    logit = jnp.sum(hg * w2_ref[...], axis=-1, keepdims=True) + b2_ref[...]
    pd_score = jax.nn.sigmoid(logit)

    score = 0.7 * pd_score + 0.3 * dtw_sim             # (TB, 1), bounded in (0, 1]
    # torch.nan_to_num(scores, nan=0.5, posinf=1.0, neginf=0.0): both terms are
    # bounded so only the NaN branch can ever fire.
    score = jnp.where(jnp.isnan(score), 0.5, score)

    # Lane-dense store: batch on the lane axis (unmasked vst when TB % 128 == 0;
    # the small-batch full-array tile is a masked store, which is fine there).
    out_ref[...] = jnp.transpose(score).astype(out_ref.dtype)       # (1, TB)


def dtw_repetition_tracker_forward(freq_history, params, *, embedding_dim,
                                   tile_b=None, use_bf16_input=False,
                                   approx_gelu=True,
                                   vmem_limit_bytes=32 * 1024 * 1024):
    """freq_history: (B, T, F).  Returns repetition scores (B, 1) float32."""
    freq_history = jnp.asarray(freq_history)
    B, T, F = freq_history.shape
    if T < 2:
        # PyTorch path: fewer than 2 history steps -> constant 0.5 scores.
        return jnp.full((B, 1), 0.5, dtype=jnp.float32)

    cutoff = int(F * 0.6)
    TF = T * F

    w1, b1, g, bta, w2, b2 = [jnp.asarray(p, jnp.float32) for p in params]
    hidden = w1.shape[1]
    # Zero-pad w1 rows to the full F so lanes f >= cutoff contribute 0.
    w1f = jnp.pad(w1, ((0, F - w1.shape[0]), (0, 0)))
    b1 = b1.reshape(1, hidden)
    g = g.reshape(1, hidden)
    bta = bta.reshape(1, hidden)
    w2_row = w2.reshape(1, hidden)        # (hidden, 1) -> lane-major row for VPU dot
    b2 = b2.reshape(1, 1)

    # Flatten (T, F) onto the lane axis (free, contiguous reshape).
    in_dtype = jnp.bfloat16 if use_bf16_input else jnp.float32
    itemsize = 2 if use_bf16_input else 4
    hist = freq_history.reshape(B, TF).astype(in_dtype)

    # Precomputed cutoff mask over the flattened lane axis (freq = lane % F).
    mask = ((jnp.arange(TF, dtype=jnp.int32) % F) < cutoff).astype(jnp.float32)
    mask = mask.reshape(1, TF)

    # ---- Batch tiling: biggest tile whose double-buffered pair fits in ~half
    # the scoped VMEM limit, rounded to a multiple of 128, capped at 8192 rows.
    padded_row_bytes = _round_up(TF, 128) * itemsize            # VMEM lane padding
    tb_cap = (vmem_limit_bytes // 2) // (2 * padded_row_bytes)
    tb_cap = max(128, min(8192, (tb_cap // 128) * 128))
    if tile_b is not None:
        tb_cap = tile_b

    if B <= 256 and B <= tb_cap:
        # Small batch: single full-array tile (block == full dims, alignment-free).
        tb, b_pad, hist_p = B, B, hist
    else:
        # Large batch: aim for >= 2 grid steps so megacore / v7x 2-TC sharding
        # has work, while keeping the double-buffered tile inside the budget.
        tb = min(tb_cap, _round_up(_round_up(B, 2) // 2, 128))
        tb = max(128, (tb // 128) * 128)
        b_pad = _round_up(B, tb)
        hist_p = jnp.pad(hist, ((0, b_pad - B), (0, 0))) if b_pad != B else hist

    grid = (b_pad // tb,)

    def _resident(arr):
        nd = arr.ndim
        return pl.BlockSpec(arr.shape, lambda i, _nd=nd: (0,) * _nd)  # VMEM-resident

    kernel = functools.partial(
        _rep_tracker_kernel, T=T, F=F, cutoff=cutoff,
        inv_emb=1.0 / float(embedding_dim), approx_gelu=approx_gelu)

    out = pl.pallas_call(
        kernel,
        out_shape=jax.ShapeDtypeStruct((1, b_pad), jnp.float32),
        grid=grid,
        in_specs=[
            # TODO(synk): if a profile still shows exposed DMA at large tiles,
            # add pipeline_mode=pl.Buffered(3) on this spec and re-sweep.
            pl.BlockSpec((tb, TF), lambda i: (i, 0)),      # pipelined batch tiles
            _resident(mask), _resident(w1f), _resident(b1), _resident(g),
            _resident(bta), _resident(w2_row), _resident(b2),
        ],
        out_specs=pl.BlockSpec((1, tb), lambda i: (0, i)),  # lane-dense scores
        compiler_params=pltpu.CompilerParams(
            dimension_semantics=("parallel",),              # megacore / 2-TC sharding
            vmem_limit_bytes=vmem_limit_bytes,              # safe on v5e/v6e/v7x
        ),
    )(hist_p, mask, w1f, b1, g, bta, w2_row, b2)

    return out[:, :B].reshape(B, 1).astype(jnp.float32)


def init_params(key, cutoff):
    """Deterministic synthetic init matching the dynamically-built pattern_detector."""
    hidden = max(cutoff // 4, 16)
    k1, k2 = jax.random.split(key)
    # xavier_normal_: std = sqrt(2/(fan_in+fan_out)); biases zero; LN affine = 1 / 0.
    std1 = math.sqrt(2.0 / (cutoff + hidden))
    w1 = (std1 * jax.random.normal(k1, (cutoff, hidden))).astype(jnp.float32)
    b1 = jnp.zeros((1, hidden), jnp.float32)
    g = jnp.ones((1, hidden), jnp.float32)
    bta = jnp.zeros((1, hidden), jnp.float32)
    std2 = math.sqrt(2.0 / (hidden + 1))
    w2 = (std2 * jax.random.normal(k2, (hidden, 1))).astype(jnp.float32)
    b2 = jnp.zeros((1, 1), jnp.float32)
    return (w1, b1, g, bta, w2, b2)


# TODO(synk): the Python-side dtw_cache dict / freq_history_list deque (host
# state) have no device-kernel equivalent; the history tensor is passed in
# explicitly, and many audio frames should be stacked into the batch axis of a
# single call to amortize launch overhead.

if __name__ == "__main__":
    B, T, F_dim, emb_dim = 2, 3, 32, 32   # batch=2, window_size=3 history steps, 32 freq bins
    key = jax.random.PRNGKey(0)
    k_hist, k_params = jax.random.split(key)

    # Magnitude spectra (non-negative), as stored by update_freq_history.
    freq_history = jnp.abs(jax.random.normal(k_hist, (B, T, F_dim))).astype(jnp.float32)

    cutoff = int(F_dim * 0.6)
    params = init_params(k_params, cutoff)

    scores = dtw_repetition_tracker_forward(freq_history, params, embedding_dim=emb_dim)
    scores = jax.block_until_ready(scores)
    assert scores.shape == (B, 1) and scores.dtype == jnp.float32
    assert bool(jnp.all(jnp.isfinite(scores)))
    print("KERNEL_OK")
</pallas_src>

<mosaic_0001>
module attributes {stable_mosaic.version = 11 : i64} {
  func.func @_rep_tracker_kernel(%arg0: i32, %arg1: memref<2x96xf32, #tpu.memory_space<vmem>>, %arg2: memref<1x96xf32, #tpu.memory_space<vmem>>, %arg3: memref<32x16xf32, #tpu.memory_space<vmem>>, %arg4: memref<1x16xf32, #tpu.memory_space<vmem>>, %arg5: memref<1x16xf32, #tpu.memory_space<vmem>>, %arg6: memref<1x16xf32, #tpu.memory_space<vmem>>, %arg7: memref<1x16xf32, #tpu.memory_space<vmem>>, %arg8: memref<1x1xf32, #tpu.memory_space<vmem>>, %arg9: memref<1x2xf32, #tpu.memory_space<vmem>>) attributes {dimension_semantics = [#tpu.dimension_semantics<parallel>], iteration_bounds = array<i64: 1>, scalar_prefetch = 0 : i64, scratch_operands = 0 : i64, tpu.core_type = #tpu.core_type<tc>, window_params = [{transform_indices = @transform_0, window_bounds = array<i64: 2, 96>}, {pipeline_mode = #tpu.pipeline_mode<synchronous>, transform_indices = @transform_1, window_bounds = array<i64: 1, 96>}, {pipeline_mode = #tpu.pipeline_mode<synchronous>, transform_indices = @transform_2, window_bounds = array<i64: 32, 16>}, {pipeline_mode = #tpu.pipeline_mode<synchronous>, transform_indices = @transform_3, window_bounds = array<i64: 1, 16>}, {pipeline_mode = #tpu.pipeline_mode<synchronous>, transform_indices = @transform_4, window_bounds = array<i64: 1, 16>}, {pipeline_mode = #tpu.pipeline_mode<synchronous>, transform_indices = @transform_5, window_bounds = array<i64: 1, 16>}, {pipeline_mode = #tpu.pipeline_mode<synchronous>, transform_indices = @transform_6, window_bounds = array<i64: 1, 16>}, {pipeline_mode = #tpu.pipeline_mode<synchronous>, transform_indices = @transform_7, window_bounds = array<i64: 1, 1>}, {transform_indices = @transform_8, window_bounds = array<i64: 1, 2>}]} {
    %c0 = arith.constant 0 : index
    %c0_0 = arith.constant 0 : index
    %0 = vector.load %arg1[%c0, %c0_0] : memref<2x96xf32, #tpu.memory_space<vmem>>, vector<2x96xf32>
    %c0_1 = arith.constant 0 : index
    %c0_2 = arith.constant 0 : index
    %1 = vector.load %arg2[%c0_1, %c0_2] : memref<1x96xf32, #tpu.memory_space<vmem>>, vector<1x96xf32>
    %2 = arith.cmpf one, %0, %0 : vector<2x96xf32>
    %cst = arith.constant dense<true> : vector<2x96xi1>
    %3 = arith.xori %2, %cst : vector<2x96xi1>
    %cst_3 = arith.constant 0.000000e+00 : f32
    %4 = vector.broadcast %cst_3 : f32 to vector<1x96xf32>
    %5 = arith.cmpf ogt, %1, %4 : vector<1x96xf32>
    %6 = vector.broadcast %5 : vector<1x96xi1> to vector<2x96xi1>
    %7 = arith.andi %3, %6 : vector<2x96xi1>
    %cst_4 = arith.constant 0x7F800000 : f32
    %8 = vector.broadcast %cst_4 : f32 to vector<2x96xf32>
    %9 = arith.cmpf oeq, %0, %8 : vector<2x96xf32>
    %cst_5 = arith.constant 0xFF800000 : f32
    %10 = vector.broadcast %cst_5 : f32 to vector<2x96xf32>
    %11 = arith.cmpf oeq, %0, %10 : vector<2x96xf32>
    %cst_6 = arith.constant -1.000000e+00 : f32
    %12 = vector.broadcast %cst_6 : f32 to vector<2x96xf32>
    %13 = arith.select %11, %12, %0 : vector<2x96xi1>, vector<2x96xf32>
    %cst_7 = arith.constant 1.000000e+00 : f32
    %14 = vector.broadcast %cst_7 : f32 to vector<2x96xf32>
    %15 = arith.select %9, %14, %13 : vector<2x96xi1>, vector<2x96xf32>
    %cst_8 = arith.constant 0.000000e+00 : f32
    %16 = vector.broadcast %cst_8 : f32 to vector<2x96xf32>
    %17 = arith.select %7, %15, %16 : vector<2x96xi1>, vector<2x96xf32>
    %18 = vector.extract_strided_slice %17 {offsets = [0, 0], sizes = [2, 32], strides = [1, 1]} : vector<2x96xf32> to vector<2x32xf32>
    %19 = vector.extract_strided_slice %17 {offsets = [0, 32], sizes = [2, 32], strides = [1, 1]} : vector<2x96xf32> to vector<2x32xf32>
    %20 = arith.addf %18, %19 : vector<2x32xf32>
    %21 = vector.extract_strided_slice %17 {offsets = [0, 64], sizes = [2, 32], strides = [1, 1]} : vector<2x96xf32> to vector<2x32xf32>
    %22 = arith.addf %20, %21 : vector<2x32xf32>
    %23 = vector.extract_strided_slice %17 {offsets = [0, 64], sizes = [2, 32], strides = [1, 1]} : vector<2x96xf32> to vector<2x32xf32>
    %cst_9 = arith.constant dense<0.000000e+00> : vector<2xf32>
    %24 = vector.multi_reduction <add>, %22, %cst_9 [1] : vector<2x32xf32> to vector<2xf32>
    %25 = vector.shape_cast %24 : vector<2xf32> to vector<2x1xf32>
    %cst_10 = arith.constant 0.0175438598 : f32
    %26 = vector.broadcast %cst_10 : f32 to vector<2x1xf32>
    %27 = arith.mulf %25, %26 : vector<2x1xf32>
    %28 = vector.broadcast %27 : vector<2x1xf32> to vector<2x96xf32>
    %29 = arith.subf %17, %28 : vector<2x96xf32>
    %30 = vector.broadcast %1 : vector<1x96xf32> to vector<2x96xf32>
    %31 = arith.mulf %29, %30 : vector<2x96xf32>
    %32 = arith.mulf %31, %31 : vector<2x96xf32>
    %cst_11 = arith.constant dense<0.000000e+00> : vector<2xf32>
    %33 = vector.multi_reduction <add>, %32, %cst_11 [1] : vector<2x96xf32> to vector<2xf32>
    %34 = vector.shape_cast %33 : vector<2xf32> to vector<2x1xf32>
    %cst_12 = arith.constant 0.0178571437 : f32
    %35 = vector.broadcast %cst_12 : f32 to vector<2x1xf32>
    %36 = arith.mulf %34, %35 : vector<2x1xf32>
    %37 = math.sqrt %36 : vector<2x1xf32>
    %cst_13 = arith.constant 9.99999997E-7 : f32
    %38 = vector.broadcast %cst_13 : f32 to vector<2x1xf32>
    %39 = arith.addf %37, %38 : vector<2x1xf32>
    %40 = tpu.reciprocal %39 {approx = true} : vector<2x1xf32> -> vector<2x1xf32>
    %41 = arith.subf %22, %23 : vector<2x32xf32>
    %cst_14 = arith.constant 5.000000e-01 : f32
    %42 = vector.broadcast %cst_14 : f32 to vector<2x32xf32>
    %43 = arith.mulf %41, %42 : vector<2x32xf32>
    %44 = vector.broadcast %27 : vector<2x1xf32> to vector<2x32xf32>
    %45 = arith.subf %23, %44 : vector<2x32xf32>
    %46 = vector.broadcast %40 : vector<2x1xf32> to vector<2x32xf32>
    %47 = arith.mulf %45, %46 : vector<2x32xf32>
    %48 = vector.broadcast %27 : vector<2x1xf32> to vector<2x32xf32>
    %49 = arith.subf %43, %48 : vector<2x32xf32>
    %50 = vector.broadcast %40 : vector<2x1xf32> to vector<2x32xf32>
    %51 = arith.mulf %49, %50 : vector<2x32xf32>
    %52 = arith.subf %47, %51 : vector<2x32xf32>
    %53 = arith.mulf %52, %52 : vector<2x32xf32>
    %cst_15 = arith.constant dense<0.000000e+00> : vector<2xf32>
    %54 = vector.multi_reduction <add>, %53, %cst_15 [1] : vector<2x32xf32> to vector<2xf32>
    %55 = vector.shape_cast %54 : vector<2xf32> to vector<2x1xf32>
    %56 = math.sqrt %55 : vector<2x1xf32>
    %cst_16 = arith.constant -3.125000e-02 : f32
    %57 = vector.broadcast %cst_16 : f32 to vector<2x1xf32>
    %58 = arith.mulf %56, %57 : vector<2x1xf32>
    %59 = math.exp %58 : vector<2x1xf32>
    %c0_17 = arith.constant 0 : index
    %c0_18 = arith.constant 0 : index
    %60 = vector.load %arg3[%c0_17, %c0_18] : memref<32x16xf32, #tpu.memory_space<vmem>>, vector<32x16xf32>
    %cst_19 = arith.constant dense<0.000000e+00> : vector<2x16xf32>
    %61 = tpu.matmul %47, %60, %cst_19 {dimension_numbers = #tpu.dot_dimension_numbers<[1], [0], [0], [1], [0, 0, 1, 1], [], []>} : vector<2x32xf32>, vector<32x16xf32>, vector<2x16xf32> -> vector<2x16xf32>
    %c0_20 = arith.constant 0 : index
    %c0_21 = arith.constant 0 : index
    %62 = vector.load %arg4[%c0_20, %c0_21] : memref<1x16xf32, #tpu.memory_space<vmem>>, vector<1x16xf32>
    %63 = vector.broadcast %62 : vector<1x16xf32> to vector<2x16xf32>
    %64 = arith.addf %61, %63 : vector<2x16xf32>
    %cst_22 = arith.constant dense<0.000000e+00> : vector<2xf32>
    %65 = vector.multi_reduction <add>, %64, %cst_22 [1] : vector<2x16xf32> to vector<2xf32>
    %66 = vector.shape_cast %65 : vector<2xf32> to vector<2x1xf32>
    %cst_23 = arith.constant 1.600000e+01 : f32
    %67 = vector.broadcast %cst_23 : f32 to vector<2x1xf32>
    %68 = arith.divf %66, %67 : vector<2x1xf32>
    %69 = vector.broadcast %68 : vector<2x1xf32> to vector<2x16xf32>
    %70 = arith.subf %64, %69 : vector<2x16xf32>
    %71 = arith.mulf %70, %70 : vector<2x16xf32>
    %cst_24 = arith.constant dense<0.000000e+00> : vector<2xf32>
    %72 = vector.multi_reduction <add>, %71, %cst_24 [1] : vector<2x16xf32> to vector<2xf32>
    %73 = vector.shape_cast %72 : vector<2xf32> to vector<2x1xf32>
    %cst_25 = arith.constant 1.600000e+01 : f32
    %74 = vector.broadcast %cst_25 : f32 to vector<2x1xf32>
    %75 = arith.divf %73, %74 : vector<2x1xf32>
    %cst_26 = arith.constant 9.99999974E-6 : f32
    %76 = vector.broadcast %cst_26 : f32 to vector<2x1xf32>
    %77 = arith.addf %75, %76 : vector<2x1xf32>
    %78 = math.rsqrt %77 : vector<2x1xf32>
    %79 = vector.broadcast %78 : vector<2x1xf32> to vector<2x16xf32>
    %80 = arith.mulf %70, %79 : vector<2x16xf32>
    %c0_27 = arith.constant 0 : index
    %c0_28 = arith.constant 0 : index
    %81 = vector.load %arg5[%c0_27, %c0_28] : memref<1x16xf32, #tpu.memory_space<vmem>>, vector<1x16xf32>
    %82 = vector.broadcast %81 : vector<1x16xf32> to vector<2x16xf32>
    %83 = arith.mulf %80, %82 : vector<2x16xf32>
    %c0_29 = arith.constant 0 : index
    %c0_30 = arith.constant 0 : index
    %84 = vector.load %arg6[%c0_29, %c0_30] : memref<1x16xf32, #tpu.memory_space<vmem>>, vector<1x16xf32>
    %85 = vector.broadcast %84 : vector<1x16xf32> to vector<2x16xf32>
    %86 = arith.addf %83, %85 : vector<2x16xf32>
    %cst_31 = arith.constant 5.000000e-01 : f32
    %87 = vector.broadcast %cst_31 : f32 to vector<2x16xf32>
    %88 = arith.mulf %87, %86 : vector<2x16xf32>
    %cst_32 = arith.constant 4.471500e-02 : f32
    %89 = vector.broadcast %cst_32 : f32 to vector<2x16xf32>
    %90 = arith.mulf %89, %86 : vector<2x16xf32>
    %91 = arith.mulf %90, %86 : vector<2x16xf32>
    %92 = arith.mulf %91, %86 : vector<2x16xf32>
    %93 = arith.addf %86, %92 : vector<2x16xf32>
    %cst_33 = arith.constant 0.797884583 : f32
    %94 = vector.broadcast %cst_33 : f32 to vector<2x16xf32>
    %95 = arith.mulf %94, %93 : vector<2x16xf32>
    %96 = math.tanh %95 : vector<2x16xf32>
    %cst_34 = arith.constant 1.000000e+00 : f32
    %97 = vector.broadcast %cst_34 : f32 to vector<2x16xf32>
    %98 = arith.addf %97, %96 : vector<2x16xf32>
    %99 = arith.mulf %88, %98 : vector<2x16xf32>
    %c0_35 = arith.constant 0 : index
    %c0_36 = arith.constant 0 : index
    %100 = vector.load %arg7[%c0_35, %c0_36] : memref<1x16xf32, #tpu.memory_space<vmem>>, vector<1x16xf32>
    %101 = vector.broadcast %100 : vector<1x16xf32> to vector<2x16xf32>
    %102 = arith.mulf %99, %101 : vector<2x16xf32>
    %cst_37 = arith.constant dense<0.000000e+00> : vector<2xf32>
    %103 = vector.multi_reduction <add>, %102, %cst_37 [1] : vector<2x16xf32> to vector<2xf32>
    %104 = vector.shape_cast %103 : vector<2xf32> to vector<2x1xf32>
    %c0_38 = arith.constant 0 : index
    %c0_39 = arith.constant 0 : index
    %105 = vector.load %arg8[%c0_38, %c0_39] : memref<1x1xf32, #tpu.memory_space<vmem>>, vector<1x1xf32>
    %106 = vector.broadcast %105 : vector<1x1xf32> to vector<2x1xf32>
    %107 = arith.addf %104, %106 : vector<2x1xf32>
    %108 = arith.negf %107 : vector<2x1xf32>
    %109 = math.exp %108 : vector<2x1xf32>
    %cst_40 = arith.constant 1.000000e+00 : f32
    %110 = vector.broadcast %cst_40 : f32 to vector<2x1xf32>
    %111 = arith.addf %110, %109 : vector<2x1xf32>
    %112 = arith.divf %110, %111 : vector<2x1xf32>
    %cst_41 = arith.constant 0.699999988 : f32
    %113 = vector.broadcast %cst_41 : f32 to vector<2x1xf32>
    %114 = arith.mulf %113, %112 : vector<2x1xf32>
    %cst_42 = arith.constant 3.000000e-01 : f32
    %115 = vector.broadcast %cst_42 : f32 to vector<2x1xf32>
    %116 = arith.mulf %115, %59 : vector<2x1xf32>
    %117 = arith.addf %114, %116 : vector<2x1xf32>
    %118 = arith.cmpf one, %117, %117 : vector<2x1xf32>
    %cst_43 = arith.constant 5.000000e-01 : f32
    %119 = vector.broadcast %cst_43 : f32 to vector<2x1xf32>
    %120 = arith.select %118, %119, %117 : vector<2x1xi1>, vector<2x1xf32>
    %121 = tpu.transpose %120, [1, 0] : vector<2x1xf32> -> vector<1x2xf32>
    %c0_44 = arith.constant 0 : index
    %c0_45 = arith.constant 0 : index
    %122 = vector.load %arg9[%c0_44, %c0_45] : memref<1x2xf32, #tpu.memory_space<vmem>>, vector<1x2xf32>
    tpu.vector_store %arg9[%c0_44, %c0_45], %121 {strides = array<i32>} : memref<1x2xf32, #tpu.memory_space<vmem>>, vector<1x2xf32>,
    return
  }
  func.func @transform_0(%arg0: i32) -> (i32, i32) {
    %c0_i32 = arith.constant 0 : i32
    %c0_i32_0 = arith.constant 0 : i32
    return %arg0, %c0_i32 : i32, i32
  }
  func.func @transform_1(%arg0: i32) -> (i32, i32) {
    %c0_i32 = arith.constant 0 : i32
    %c0_i32_0 = arith.constant 0 : i32
    %c0_i32_1 = arith.constant 0 : i32
    return %c0_i32, %c0_i32_0 : i32, i32
  }
  func.func @transform_2(%arg0: i32) -> (i32, i32) {
    %c0_i32 = arith.constant 0 : i32
    %c0_i32_0 = arith.constant 0 : i32
    %c0_i32_1 = arith.constant 0 : i32
    return %c0_i32, %c0_i32_0 : i32, i32
  }
  func.func @transform_3(%arg0: i32) -> (i32, i32) {
    %c0_i32 = arith.constant 0 : i32
    %c0_i32_0 = arith.constant 0 : i32
    %c0_i32_1 = arith.constant 0 : i32
    return %c0_i32, %c0_i32_0 : i32, i32
  }
  func.func @transform_4(%arg0: i32) -> (i32, i32) {
    %c0_i32 = arith.constant 0 : i32
    %c0_i32_0 = arith.constant 0 : i32
    %c0_i32_1 = arith.constant 0 : i32
    return %c0_i32, %c0_i32_0 : i32, i32
  }
  func.func @transform_5(%arg0: i32) -> (i32, i32) {
    %c0_i32 = arith.constant 0 : i32
    %c0_i32_0 = arith.constant 0 : i32
    %c0_i32_1 = arith.constant 0 : i32
    return %c0_i32, %c0_i32_0 : i32, i32
  }
  func.func @transform_6(%arg0: i32) -> (i32, i32) {
    %c0_i32 = arith.constant 0 : i32
    %c0_i32_0 = arith.constant 0 : i32
    %c0_i32_1 = arith.constant 0 : i32
    return %c0_i32, %c0_i32_0 : i32, i32
  }
  func.func @transform_7(%arg0: i32) -> (i32, i32) {
    %c0_i32 = arith.constant 0 : i32
    %c0_i32_0 = arith.constant 0 : i32
    %c0_i32_1 = arith.constant 0 : i32
    return %c0_i32, %c0_i32_0 : i32, i32
  }
  func.func @transform_8(%arg0: i32) -> (i32, i32) {
    %c0_i32 = arith.constant 0 : i32
    %c0_i32_0 = arith.constant 0 : i32
    return %c0_i32, %arg0 : i32, i32
  }
}

</mosaic_0001>

<bundles_post_ra>
// kernel: tpu_custom_call.1
= control target key start
LH: loop header
LB: loop body
LE: loop exit
PB: predicated region body
PF: predicated region fallthrough
CT: control target
= control target key end

     0   :  { %s503_s0 = inlined_call_operand.vmem [shape: f32[2,96], index: 0, kind: input, shape index: {}]   ;;  %s504_s1 = inlined_call_operand.vmem [shape: f32[1,96], index: 1, kind: input, shape index: {}]   ;;  %s505_s2 = inlined_call_operand.vmem [shape: f32[32,16], index: 2, kind: input, shape index: {}]   ;;  %s506_s3 = inlined_call_operand.vmem [shape: f32[1,16], index: 3, kind: input, shape index: {}]   ;;  %s507_s4 = inlined_call_operand.vmem [shape: f32[1,16], index: 4, kind: input, shape index: {}]   ;;  %s508_s5 = inlined_call_operand.vmem [shape: f32[1,16], index: 5, kind: input, shape index: {}]   ;;  %s509_s6 = inlined_call_operand.vmem [shape: f32[1,16], index: 6, kind: input, shape index: {}]   ;;  %s510_s7 = inlined_call_operand.<no memory space> [shape: f32[1,1], index: 7, kind: input, shape index: {}]   ;;  %s511_s8 = inlined_call_operand.hbm [shape: f32[1,2], index: 8, kind: output, shape index: {}]  }
   0x1   :  { %v13_v0 = vstv %s510_s7 }
   0x2   :  { %14 = vst [vmem:[#allocation2] sm:$0x1] %v13_v0 }
   0x3   :  { %v32_v1 = vld [vmem:[%s503_s0] sm:$0x3]  ;;  %v38_v3 = vlaneseq  ;;  %v396_v5 = vmov 0  }
   0x4   :  { %v33_v2 = vld [vmem:[%s504_s1] sm:$0x1]  ;;  %vm45_vm1 = vcmp.eq.f32.partialorder %v32_v1, -inf  ;;  %vm34_vm2 = vcmp.ne.f32.partialorder %v32_v1, %v32_v1 }
   0x5   :  { %vm36_vm0 = vcmp.gt.f32.partialorder %v33_v2, 0.0  ;;  %v39_v4 = vshrl.u32 %v38_v3, 7 }
   0x6   :  { %v37_v6 = vsel %vm36_vm0, 1, %v396_v5 }
   0x7   :  { %15 = vsyncpa [#allocation4], 0  ;;  %v40_v7 = vsub.s32 0, %v39_v4  ;;  %vm44_vm3 = vcmp.eq.f32.partialorder %v32_v1, inf  ;;  %v46_v8 = vsel %vm45_vm1, -1.0, %v32_v1  ;;  %vm397_vm4 = vmmov 1  }
   0x8   :  { %vm35_vm5 = vmxor %vm34_vm2, %vm397_vm4  ;;  %v47_v10 = vsel %vm44_vm3, 1.0, %v46_v8  ;;  %s398_s0 = smov 96   ;;  %s399_s1 = smov 64   ;;  %vm58_vm8 = vcmask 254976   ;;  %vm72_vm9 = vcmask 779264   ;;  %v114_v27 = vld [vmem:[%s505_s2] sm:$0xff] }
   0x9   :  { %v41_v9 = vrot.slane %v37_v6, %v40_v7  ;;  %v68_v21 = vrot.slane %v33_v2, %v40_v7  ;;  %v115_v28 = vld [vmem:[%s505_s2 + $0x8] sm:$0xff]  ;;  %v116_v29 = vld [vmem:[%s505_s2 + $0x10] sm:$0xff]  ;;  %v400_v30 = vmov 0.0|0.0   ;;  %v117_v32 = vld [vmem:[%s505_s2 + $0x18] sm:$0xff]  ;;  %vm401_vm10 = vmmov 0  }
   0xa   :  { %342 = vmatprep.subr.bf16.mxu0 %v400_v30  ;;  %v343_v31 = vpack.c.bf16 %v115_v28, %v114_v27  ;;  %v402_v33 = vmov 0.0   ;;  %v346_v34 = vpack.c.bf16 %v117_v32, %v116_v29  ;;  %vm128_vm13 = vcmask 261120   ;;  %v319_v50 = vld [vmem:[%s506_s3] ss:$0 sm:$0xff] }
   0xb   :  { %vm42_vm6 = vcmp.eq.s32.totalorder %v41_v9, 1  ;;  %339 = vmatprep.mubr.msk.f32.mxu0 %vm401_vm10, %v402_v33  ;;  %vm201_vm14 = vcmask 123904   ;;  %v321_v2 = vld [vmem:[%s507_s4] ss:$0 sm:$0xff]  ;;  %s403_s4 = smov [#allocation3]   ;;  %vm303_vm2 = vcmask 8192  }
   0xc   :  { %vm43_vm7 = vmand %vm35_vm5, %vm42_vm6  ;;  %344 = vmatpush3.bf16.msra.mxu0 %v343_v31  ;;  %v322_v4 = vld [vmem:[%s508_s5] ss:$0 sm:$0xff]  ;;  %s311_s5 = sshll.u32 %s403_s4, 4  ;;  %s312_s5 = int_to_ptr.vmem [resolvable:$true] %s311_s5 }
   0xd   :  { %v48_v11 = vsel %vm43_vm7, %v47_v10, 0.0  ;;  %345 = vmatprep.subr.bf16.mxu0 %v400_v30  ;;  %s376_s24 = scalar_lea.vmem %s312_s5, 32  ;;  %p377_p1 = scmp.lt.s32.totalorder %s312_s5, %s312_s5 }
   0xe   :  { %50 = vrot.lane.b32.xlu0 %v48_v11, %s398_s0 }
  0x10   :  { %347 = vmatpush3.bf16.msra.mxu0 %v346_v34 }
  0x12   :  { %54 = vrot.lane.b32.xlu0 %v48_v11, %s399_s1 }
  0x80   :  { %v51_v12 = vpop.permute.xlu0 %50 }
  0x81   :  { %v53_v13 = vadd.f32 %v51_v12, %v48_v11 }
  0x84   :  { %v55_v14 = vpop.permute.xlu0 %54 }
  0x85   :  { %v57_v15 = vadd.f32 %v55_v14, %v53_v13 }
  0x87   :  { %v59_v16 = vsel %vm58_vm8, %v57_v15, 0.0  ;;  %v86_v17 = vsub.f32 %v57_v15, %v55_v14  ;;  %v323_v15 = vld [vmem:[%s509_s6] ss:$0 sm:$0xff]  ;;  %s372_s6 = scalar_lea.vmem %s312_s5, 16 }
  0x88   :  { %60 = vadd.xlane.f32.xlu1 %v59_v16  ;;  %p373_p0 = scmp.ne.s32.totalorder %s312_s5, %s372_s6  ;;  %p378_p2 = scmp.lt.s32.totalorder %s376_s24, %s372_s6 }
  0x89   :  { %v87_v19 = vmul.f32 0.5, %v86_v17 }
  0x8a   :  { %p379_p3 = por %p378_p2, %p377_p1 }
  0x8c   :  { %p380_p4 = pnand %p379_p3, %p373_p0 }
 0x115   :  { %v61_v18 = vpop.xlane.xlu1 %60 }
 0x116   :  { %v62_v20 = vmul.f32 0.01754386, %v61_v18 }
 0x118   :  { %v63_v22 = vsub.f32 %v48_v11, %v62_v20  ;;  %v89_v23 = vsub.f32 %v87_v19, %v62_v20 }
 0x11a   :  { %v70_v24 = vmul.f32 %v68_v21, %v63_v22 }
 0x11c   :  { %v71_v25 = vmul.f32 %v70_v24, %v70_v24 }
 0x11e   :  { %v73_v26 = vsel %vm72_vm9, %v71_v25, 0.0 }
 0x11f   :  { %74 = vadd.xlane.f32.xlu1 %v73_v26 }
 0x1ac   :  { %v75_v35 = vpop.xlane.xlu1 %74 }
 0x1ad   :  { %v76_v36 = vmul.f32 0.017857144, %v75_v35 }
 0x1af   :  { %356 = vrsqrt.f32 %v76_v36  ;;  %vm79_vm11 = vcmp.eq.f32.partialorder %v76_v36, inf  ;;  %v82_v39 = vand.u32 2147483648, %v76_v36  ;;  %vm81_vm12 = vcmp.eq.f32.partialorder %v76_v36, 0.0 }
 0x1b9   :  { %v357_v37 = vpop.eup %356 }
 0x1ba   :  { %v78_v38 = vmul.f32 %v357_v37, %v76_v36 }
 0x1bc   :  { %v80_v40 = vsel %vm79_vm11, %v76_v36, %v78_v38 }
 0x1bd   :  { %v83_v41 = vsel %vm81_vm12, %v82_v39, %v80_v40 }
 0x1be   :  { %v84_v42 = vadd.f32 1e-06, %v83_v41 }
 0x1c0   :  { %358 = vrcp.f32 %v84_v42 }
 0x1ca   :  { %v359_v43 = vpop.eup %358 }
 0x1cb   :  { %v88_v44 = vmul.f32 %v359_v43, %v63_v22  ;;  %v90_v45 = vmul.f32 %v359_v43, %v89_v23  ;;  %v324_v22 = vld [vmem:[#allocation2] ss:$0 sm:$0xff] }
 0x1cd   :  { %126 = vrot.lane.b32.xlu0 %v88_v44, %s399_s1 }
 0x1d1   :  { %92 = vrot.lane.b32.xlu0 %v90_v45, %s399_s1 }
 0x23f   :  { %v127_v46 = vpop.permute.xlu0 %126 }
 0x240   :  { %340 = vmatmul.mubr.msk.f32.vlgmr.msra.gmra.mrb[0].mxu0 %vm128_vm13, %v127_v46 }
 0x243   :  { %v93_v47 = vpop.permute.xlu0 %92 }
 0x244   :  { %v95_v48 = vsub.f32 %v88_v44, %v93_v47 }
 0x246   :  { %v96_v49 = vmul.f32 %v95_v48, %v95_v48 }
 0x248   :  { %98 = vrot.lane.b32.xlu0 %v96_v49, %s399_s1 }
 0x2ba   :  { %v99_v60 = vpop.permute.xlu0 %98 }
 0x2bb   :  { %v101_v61 = vsel %vm58_vm8, %v99_v60, 0.0 }
 0x313   :  { %v197_v51 = vpop.f32.mrb[0].mxu0 }
 0x314   :  { %v198_v52 = vadd.f32 %v319_v50, %v197_v51  ;;  %v341_v53 = vpop.f32.mrb[1].mxu0 }
 0x316   :  { %v202_v54 = vsel %vm201_vm14, %v198_v52, 0.0 }
 0x317   :  { %203 = vadd.xlane.f32.xlu1 %v202_v54 }
 0x3a4   :  { %v204_v55 = vpop.xlane.xlu1 %203 }
 0x3a5   :  { %v206_v56 = vmul.f32 0.0625, %v204_v55 }
 0x3a7   :  { %v207_v57 = vsub.f32 %v198_v52, %v206_v56 }
 0x3a9   :  { %v208_v58 = vmul.f32 %v207_v57, %v207_v57 }
 0x3ab   :  { %v209_v59 = vsel %vm201_vm14, %v208_v58, 0.0 }
 0x3ac   :  { %210 = vadd.xlane.f32.xlu1 %v209_v59 }
 0x3b0   :  { %102 = vadd.xlane.f32.xlu1 %v101_v61 }
 0x439   :  { %v211_v62 = vpop.xlane.xlu1 %210 }
 0x43a   :  { %v212_v63 = vmul.f32 0.0625, %v211_v62 }
 0x43c   :  { %v213_v0 = vadd.f32 1e-05, %v212_v63 }
 0x43d   :  { %v103_v19 = vpop.xlane.xlu1 %102 }
 0x43e   :  { %360 = vrsqrt.f32 %v213_v0  ;;  %vm106_vm15 = vcmp.eq.f32.partialorder %v103_v19, inf  ;;  %v109_v26 = vand.u32 2147483648, %v103_v19  ;;  %vm108_vm0 = vcmp.eq.f32.partialorder %v103_v19, 0.0 }
 0x448   :  { %v361_v1 = vpop.eup %360 }
 0x449   :  { %v215_v3 = vmul.f32 %v361_v1, %v207_v57 }
 0x44b   :  { %v223_v5 = vmul.f32 %v321_v2, %v215_v3 }
 0x44d   :  { %v231_v6 = vadd.f32 %v322_v4, %v223_v5 }
 0x44f   :  { %v233_v7 = vmul.f32 0.044715, %v231_v6  ;;  %v232_v13 = vmul.f32 0.5, %v231_v6 }
 0x451   :  { %v234_v8 = vmul.f32 %v233_v7, %v231_v6 }
 0x453   :  { %v235_v9 = vmul.f32 %v234_v8, %v231_v6 }
 0x455   :  { %v236_v10 = vadd.f32 %v235_v9, %v231_v6 }
 0x457   :  { %v237_v11 = vmul.f32 0.7978846, %v236_v10 }
 0x459   :  { %362 = vtanh.f32 %v237_v11 }
 0x45a   :  { %364 = vrsqrt.f32 %v103_v19 }
 0x463   :  { %v363_v12 = vpop.eup %362 }
 0x464   :  { %v239_v14 = vadd.f32 1.0, %v363_v12  ;;  %v365_v20 = vpop.eup %364 }
 0x465   :  { %v105_v21 = vmul.f32 %v365_v20, %v103_v19 }
 0x466   :  { %v240_v16 = vmul.f32 %v239_v14, %v232_v13 }
 0x467   :  { %v107_v25 = vsel %vm106_vm15, %v103_v19, %v105_v21 }
 0x468   :  { %v248_v17 = vmul.f32 %v323_v15, %v240_v16  ;;  %v110_v28 = vsel %vm108_vm0, %v109_v26, %v107_v25 }
 0x469   :  { %v111_v29 = vmul.f32 -0.03125, %v110_v28 }
 0x46a   :  { %v249_v18 = vsel %vm201_vm14, %v248_v17, 0.0 }
 0x46b   :  { %250 = vadd.xlane.f32.xlu0 %v249_v18  ;;  %v112_v30 = vmul.f32 1.442695, %v111_v29 }
 0x4f8   :  { %v251_v23 = vpop.xlane.xlu0 %250 }
 0x4f9   :  { %v259_v24 = vadd.f32 %v324_v22, %v251_v23 }
 0x4fb   :  { %v325_v27 = vmul.f32 -1.442695, %v259_v24 }
 0x4fd   :  { %366 = vpow2.f32 %v325_v27 }
 0x4fe   :  { %368 = vpow2.f32 %v112_v30 }
 0x507   :  { %v367_v31 = vpop.eup %366 }
 0x508   :  { %v263_v32 = vadd.f32 1.0, %v367_v31  ;;  %v369_v33 = vpop.eup %368 }
 0x509   :  { %v267_v36 = vmul.f32 0.3, %v369_v33 }
 0x50a   :  { %370 = vrcp.f32 %v263_v32 }
 0x514   :  { %v371_v34 = vpop.eup %370 }
 0x515   :  { %v266_v35 = vmul.f32 0.7, %v371_v34 }
 0x517   :  { %v268_v37 = vadd.f32 %v267_v36, %v266_v35 }
 0x519   :  { %vm269_vm1 = vcmp.ne.f32.partialorder %v268_v37, %v268_v37 }
 0x51a   :  { %v270_v38 = vsel %vm269_vm1, 0.5, %v268_v37 }
 0x51b   :  { %271 = vxpose.xlu1.b32.start.end [1/1] (short) (narrow) %v270_v38, 8 }
 0x59b   :  { %v287_v39 = vpop.trf.xlu1 }
 0x59c   :  { %304 = vst.msk [vmem:[#allocation3] sm:$0x1] %vm303_vm2, %v287_v39 }
 0x59d   :  { %383 = shalt.err (!%p380_p4)
}
 0x59e   :  { %s384_s27 = scalar_lea.hbm %s511_s8, 16 }
 0x59f   :  { %p385_p5 = scmp.ne.s32.totalorder %s511_s8, %s384_s27  ;;  %p388_p6 = scmp.lt.u32.totalorder %s384_s27, %s511_s8 }
 0x5a1   :  { %p390_p7 = pnand %p388_p6, %p385_p5 }
 0x5a3   :  { %393 = shalt.err (!%p390_p7)
}
 0x5a4   :  { %314 = dma.vmem_to_hbm [thread:$0]  %s312_s5, 16, %s511_s8, [#allocation4]  }
 0x5a5   :  { %394 = dma.done.wait [#allocation4], 16  }
 0x5a6   :  { %395 = vsyncadd [#allocation4], 4294967280 }
 0x5a7   :  { %318 = vsyncpa [#allocation4], 1 }

</bundles_post_ra>
